<compile_context>
chip_gen: v5e
topology: v5e:2x2
jax: 0.10.0
libtpu: 0.0.40
codegen_flags: <defaults>
</compile_context>

<pallas_src>
import jax
import jax.numpy as jnp
from jax.experimental import pallas as pl
from jax.experimental.pallas import tpu as pltpu


# ----------------------------------------------------------------------------
# Pallas kernel
# ----------------------------------------------------------------------------
def _make_conv_kernel(*, K, stride, L_out, relu, has_res):
    """Fused: y = sum_k x_tap_k @ w_k  (bf16 MXU, f32 acc) + bias
              [+ residual] [+ ReLU] -> store."""

    def kernel(x_ref, w_ref, b_ref, *rest):
        if has_res:
            r_ref, o_ref = rest
        else:
            (o_ref,) = rest

        acc = None
        for k in range(K):                       # static unroll over taps
            ph = k % stride                      # phase of the padded input
            off = k // stride                    # unit-stride offset in phase
            xs = x_ref[0, ph, off:off + L_out, :]          # (L_out, C_in) bf16
            d = jnp.dot(xs, w_ref[k], preferred_element_type=jnp.float32)
            acc = d if acc is None else acc + d

        y = acc + b_ref[...]                     # folded-BN bias, f32
        if has_res:
            y = y + r_ref[0].astype(jnp.float32)
        if relu:
            y = jnp.maximum(y, 0.0)
        o_ref[0] = y.astype(o_ref.dtype)

    return kernel


def _pick_tile(c):
    for t in (512, 256, 128):
        if c >= t and c % t == 0:
            return t
    return c                                     # small / ragged: full width


# ----------------------------------------------------------------------------
# Fused Conv1d + BN (eval) [+ residual] [+ ReLU]
# ----------------------------------------------------------------------------
def conv_bn_fused(x, w, bn, *, stride, padding, relu, residual=None,
                  out_dtype=jnp.bfloat16):
    """x: (N, L, C_in) ; w: torch layout (C_out, C_in, K) ;
    bn = (gamma, beta, running_mean, running_var)."""
    Nb, L, C_in = x.shape
    C_out, C_in2, K = w.shape
    assert C_in2 == C_in

    L_out = (L + 2 * padding - K) // stride + 1
    n_ph = min(stride, K)                        # phases actually referenced
    Lp = L_out + (K - 1) // stride               # per-phase length
    total = stride * Lp
    right = total - (L + padding)
    assert right >= 0

    # Pad once (zeros), then reorganize into phase-major layout
    # (N, stride*Lp, C) -> (N, n_ph, Lp, C).  Same HBM footprint as x.
    x_pad = jnp.pad(x.astype(jnp.bfloat16), ((0, 0), (padding, right), (0, 0)))
    x_ph = jnp.transpose(x_pad.reshape(Nb, Lp, stride, C_in), (0, 2, 1, 3))
    x_ph = x_ph[:, :n_ph]

    # Fold BN (inference) into weights/bias.
    gamma, beta, mean, var = bn
    inv = gamma / jnp.sqrt(var + 1e-5)           # PyTorch BN eps default
    w_f = (jnp.transpose(w, (2, 1, 0)) * inv[None, None, :]).astype(jnp.bfloat16)
    bias = (beta - mean * inv).reshape(1, C_out).astype(jnp.float32)

    tile_co = _pick_tile(C_out)
    grid = (C_out // tile_co, Nb)                # channel tiles OUTER, batch INNER

    kernel = _make_conv_kernel(K=K, stride=stride, L_out=L_out,
                               relu=relu, has_res=residual is not None)

    in_specs = [
        pl.BlockSpec((1, n_ph, Lp, C_in), lambda j, b: (b, 0, 0, 0)),
        pl.BlockSpec((K, C_in, tile_co), lambda j, b: (0, 0, j)),
        pl.BlockSpec((1, tile_co), lambda j, b: (0, j)),
    ]
    args = [x_ph, w_f, bias]
    if residual is not None:
        in_specs.append(pl.BlockSpec((1, L_out, tile_co), lambda j, b: (b, 0, j)))
        args.append(residual.astype(jnp.bfloat16))

    out = pl.pallas_call(
        kernel,
        out_shape=jax.ShapeDtypeStruct((Nb, L_out, C_out), out_dtype),
        grid=grid,
        in_specs=in_specs,
        out_specs=pl.BlockSpec((1, L_out, tile_co), lambda j, b: (b, 0, j)),
        compiler_params=pltpu.CompilerParams(
            dimension_semantics=("parallel", "parallel"),
            vmem_limit_bytes=48 * 1024 * 1024),
    )(*args)
    return out


# ----------------------------------------------------------------------------
# BasicBlock1D forward (Pallas)
# ----------------------------------------------------------------------------
def basic_block_forward(params, x_ncl):
    """x_ncl: (N, C_in, L) like PyTorch.  Returns (N, planes, L_out) float32."""
    x = jnp.transpose(x_ncl, (0, 2, 1))          # -> (N, L, C) channels-last
    stride = params["stride"]

    # conv1 + bn1 + ReLU
    out = conv_bn_fused(x, params["w1"], params["bn1"],
                        stride=stride, padding=1, relu=True)

    # downsample path (1x1 conv + BN) or plain identity
    if "dw" in params:
        identity = conv_bn_fused(x, params["dw"], params["dbn"],
                                 stride=stride, padding=0, relu=False)
    else:
        identity = x.astype(jnp.bfloat16)

    # conv2 + bn2 + residual add + ReLU, fused in one kernel
    out = conv_bn_fused(out, params["w2"], params["bn2"],
                        stride=1, padding=1, relu=True,
                        residual=identity, out_dtype=jnp.float32)
    return jnp.transpose(out, (0, 2, 1))         # back to NCL


# ----------------------------------------------------------------------------
# Plain-JAX reference (f32) for verification
# ----------------------------------------------------------------------------
def _conv1d_ref(x_ncl, w, stride, padding):
    N, C_in, L = x_ncl.shape
    C_out, _, K = w.shape
    L_out = (L + 2 * padding - K) // stride + 1
    xp = jnp.pad(x_ncl, ((0, 0), (0, 0), (padding, padding)))
    span = stride * (L_out - 1) + 1
    out = jnp.zeros((N, C_out, L_out), jnp.float32)
    for k in range(K):
        xs = xp[:, :, k:k + span:stride]
        out = out + jnp.einsum("ncl,oc->nol", xs, w[:, :, k])
    return out


def _bn_ref(x, bn):
    gamma, beta, mean, var = bn
    inv = gamma / jnp.sqrt(var + 1e-5)
    return x * inv[None, :, None] + (beta - mean * inv)[None, :, None]


def basic_block_ref(p, x_ncl):
    identity = x_ncl
    out = jax.nn.relu(_bn_ref(_conv1d_ref(x_ncl, p["w1"], p["stride"], 1),
                              p["bn1"]))
    out = _bn_ref(_conv1d_ref(out, p["w2"], 1, 1), p["bn2"])
    if "dw" in p:
        identity = _bn_ref(_conv1d_ref(x_ncl, p["dw"], p["stride"], 0),
                           p["dbn"])
    return jax.nn.relu(out + identity)


# ----------------------------------------------------------------------------
# Parameter init
# ----------------------------------------------------------------------------
def init_basic_block(key, inplanes, planes, stride=1, downsample=False):
    ks = jax.random.split(key, 6)

    def conv_w(k, c_out, c_in, ksz):
        std = (2.0 / (c_in * ksz)) ** 0.5
        return std * jax.random.normal(k, (c_out, c_in, ksz), jnp.float32)

    def bn_p(k, c):
        k1, k2, k3 = jax.random.split(k, 3)
        gamma = 1.0 + 0.05 * jax.random.normal(k1, (c,), jnp.float32)
        beta = 0.05 * jax.random.normal(k2, (c,), jnp.float32)
        mean = 0.05 * jax.random.normal(k3, (c,), jnp.float32)
        var = jnp.ones((c,), jnp.float32)
        return (gamma, beta, mean, var)

    p = {
        "stride": stride,
        "w1": conv_w(ks[0], planes, inplanes, 3), "bn1": bn_p(ks[1], planes),
        "w2": conv_w(ks[2], planes, planes, 3), "bn2": bn_p(ks[3], planes),
    }
    if downsample:
        p["dw"] = conv_w(ks[4], planes, inplanes, 1)
        p["dbn"] = bn_p(ks[5], planes)
    return p


# ----------------------------------------------------------------------------
if __name__ == "__main__":
    key = jax.random.PRNGKey(0)
    kp1, kp2, kx = jax.random.split(key, 3)

    batch, in_c, seq = 2, 64, 32
    x = jax.random.normal(kx, (batch, in_c, seq), jnp.float32)   # NCL

    # Block 1: stride=1, identity residual (inplanes == planes)
    p1 = init_basic_block(kp1, inplanes=64, planes=64, stride=1,
                          downsample=False)
    # Block 2: stride=2 with 1x1-conv+BN downsample (inplanes != planes)
    p2 = init_basic_block(kp2, inplanes=64, planes=128, stride=2,
                          downsample=True)

    y1 = jax.block_until_ready(basic_block_forward(p1, x))
    y2 = jax.block_until_ready(basic_block_forward(p2, y1))

    assert y1.shape == (batch, 64, seq)
    assert y2.shape == (batch, 128, seq // 2)
    assert bool(jnp.all(jnp.isfinite(y1))) and bool(jnp.all(jnp.isfinite(y2)))

    # Verify against plain-JAX f32 reference (loose tol: bf16 compute path).
    r1 = basic_block_ref(p1, x)
    r2 = basic_block_ref(p2, y1)
    for out, ref in ((y1, r1), (y2, r2)):
        err = float(jnp.max(jnp.abs(out - ref)))
        tol = 0.1 + 0.05 * float(jnp.max(jnp.abs(ref)))
        assert err < tol, (err, tol)

    print("KERNEL_OK")
</pallas_src>

<mosaic_0001>
module attributes {stable_mosaic.version = 11 : i64} {
  func.func @kernel(%arg0: i32, %arg1: i32, %arg2: memref<1x1x34x64xbf16, #tpu.memory_space<vmem>>, %arg3: memref<3x64x64xbf16, #tpu.memory_space<vmem>>, %arg4: memref<1x64xf32, #tpu.memory_space<vmem>>, %arg5: memref<1x32x64xbf16, #tpu.memory_space<vmem>>) attributes {dimension_semantics = [#tpu.dimension_semantics<parallel>, #tpu.dimension_semantics<parallel>], iteration_bounds = array<i64: 1, 2>, scalar_prefetch = 0 : i64, scratch_operands = 0 : i64, tpu.core_type = #tpu.core_type<tc>, window_params = [{transform_indices = @transform_0, window_bounds = array<i64: 1, 1, 34, 64>}, {transform_indices = @transform_1, window_bounds = array<i64: 3, 64, 64>}, {transform_indices = @transform_2, window_bounds = array<i64: 1, 64>}, {transform_indices = @transform_3, window_bounds = array<i64: 1, 32, 64>}]} {
    %c0 = arith.constant 0 : index
    %c0_0 = arith.constant 0 : index
    %c0_1 = arith.constant 0 : index
    %c0_2 = arith.constant 0 : index
    %0 = vector.load %arg2[%c0, %c0_0, %c0_1, %c0_2] : memref<1x1x34x64xbf16, #tpu.memory_space<vmem>>, vector<1x1x32x64xbf16>
    %1 = vector.shape_cast %0 : vector<1x1x32x64xbf16> to vector<32x64xbf16>
    %c0_3 = arith.constant 0 : index
    %c0_4 = arith.constant 0 : index
    %c0_5 = arith.constant 0 : index
    %2 = vector.load %arg3[%c0_3, %c0_4, %c0_5] : memref<3x64x64xbf16, #tpu.memory_space<vmem>>, vector<1x64x64xbf16>
    %3 = vector.shape_cast %2 : vector<1x64x64xbf16> to vector<64x64xbf16>
    %cst = arith.constant dense<0.000000e+00> : vector<32x64xf32>
    %4 = tpu.matmul %1, %3, %cst {dimension_numbers = #tpu.dot_dimension_numbers<[1], [0], [0], [1], [0, 0, 1, 1], [], []>} : vector<32x64xbf16>, vector<64x64xbf16>, vector<32x64xf32> -> vector<32x64xf32>
    %c0_6 = arith.constant 0 : index
    %c0_7 = arith.constant 0 : index
    %c1 = arith.constant 1 : index
    %c0_8 = arith.constant 0 : index
    %5 = vector.load %arg2[%c0_6, %c0_7, %c1, %c0_8] : memref<1x1x34x64xbf16, #tpu.memory_space<vmem>>, vector<1x1x32x64xbf16>
    %6 = vector.shape_cast %5 : vector<1x1x32x64xbf16> to vector<32x64xbf16>
    %c1_9 = arith.constant 1 : index
    %c0_10 = arith.constant 0 : index
    %c0_11 = arith.constant 0 : index
    %7 = vector.load %arg3[%c1_9, %c0_10, %c0_11] : memref<3x64x64xbf16, #tpu.memory_space<vmem>>, vector<1x64x64xbf16>
    %8 = vector.shape_cast %7 : vector<1x64x64xbf16> to vector<64x64xbf16>
    %cst_12 = arith.constant dense<0.000000e+00> : vector<32x64xf32>
    %9 = tpu.matmul %6, %8, %cst_12 {dimension_numbers = #tpu.dot_dimension_numbers<[1], [0], [0], [1], [0, 0, 1, 1], [], []>} : vector<32x64xbf16>, vector<64x64xbf16>, vector<32x64xf32> -> vector<32x64xf32>
    %10 = arith.addf %4, %9 : vector<32x64xf32>
    %c0_13 = arith.constant 0 : index
    %c0_14 = arith.constant 0 : index
    %c2 = arith.constant 2 : index
    %c0_15 = arith.constant 0 : index
    %11 = vector.load %arg2[%c0_13, %c0_14, %c2, %c0_15] : memref<1x1x34x64xbf16, #tpu.memory_space<vmem>>, vector<1x1x32x64xbf16>
    %12 = vector.shape_cast %11 : vector<1x1x32x64xbf16> to vector<32x64xbf16>
    %c2_16 = arith.constant 2 : index
    %c0_17 = arith.constant 0 : index
    %c0_18 = arith.constant 0 : index
    %13 = vector.load %arg3[%c2_16, %c0_17, %c0_18] : memref<3x64x64xbf16, #tpu.memory_space<vmem>>, vector<1x64x64xbf16>
    %14 = vector.shape_cast %13 : vector<1x64x64xbf16> to vector<64x64xbf16>
    %cst_19 = arith.constant dense<0.000000e+00> : vector<32x64xf32>
    %15 = tpu.matmul %12, %14, %cst_19 {dimension_numbers = #tpu.dot_dimension_numbers<[1], [0], [0], [1], [0, 0, 1, 1], [], []>} : vector<32x64xbf16>, vector<64x64xbf16>, vector<32x64xf32> -> vector<32x64xf32>
    %16 = arith.addf %10, %15 : vector<32x64xf32>
    %c0_20 = arith.constant 0 : index
    %c0_21 = arith.constant 0 : index
    %17 = vector.load %arg4[%c0_20, %c0_21] : memref<1x64xf32, #tpu.memory_space<vmem>>, vector<1x64xf32>
    %18 = vector.broadcast %17 : vector<1x64xf32> to vector<32x64xf32>
    %19 = arith.addf %16, %18 : vector<32x64xf32>
    %cst_22 = arith.constant 0.000000e+00 : f32
    %20 = vector.broadcast %cst_22 : f32 to vector<32x64xf32>
    %21 = arith.maximumf %19, %20 : vector<32x64xf32>
    %22 = arith.truncf %21 : vector<32x64xf32> to vector<32x64xbf16>
    %c0_23 = arith.constant 0 : index
    %c0_24 = arith.constant 0 : index
    %c0_25 = arith.constant 0 : index
    %23 = vector.load %arg5[%c0_23, %c0_24, %c0_25] : memref<1x32x64xbf16, #tpu.memory_space<vmem>>, vector<1x32x64xbf16>
    %24 = vector.shape_cast %23 : vector<1x32x64xbf16> to vector<32x64xbf16>
    %25 = vector.shape_cast %22 : vector<32x64xbf16> to vector<1x32x64xbf16>
    tpu.vector_store %arg5[%c0_23, %c0_24, %c0_25], %25 {strides = array<i32>} : memref<1x32x64xbf16, #tpu.memory_space<vmem>>, vector<1x32x64xbf16>,
    return
  }
  func.func @transform_0(%arg0: i32, %arg1: i32) -> (i32, i32, i32, i32) {
    %c0_i32 = arith.constant 0 : i32
    %c0_i32_0 = arith.constant 0 : i32
    %c0_i32_1 = arith.constant 0 : i32
    %c0_i32_2 = arith.constant 0 : i32
    return %arg1, %c0_i32, %c0_i32_0, %c0_i32_1 : i32, i32, i32, i32
  }
  func.func @transform_1(%arg0: i32, %arg1: i32) -> (i32, i32, i32) {
    %c0_i32 = arith.constant 0 : i32
    %c0_i32_0 = arith.constant 0 : i32
    %c0_i32_1 = arith.constant 0 : i32
    return %c0_i32, %c0_i32_0, %arg0 : i32, i32, i32
  }
  func.func @transform_2(%arg0: i32, %arg1: i32) -> (i32, i32) {
    %c0_i32 = arith.constant 0 : i32
    %c0_i32_0 = arith.constant 0 : i32
    return %c0_i32, %arg0 : i32, i32
  }
  func.func @transform_3(%arg0: i32, %arg1: i32) -> (i32, i32, i32) {
    %c0_i32 = arith.constant 0 : i32
    %c0_i32_0 = arith.constant 0 : i32
    return %arg1, %c0_i32, %arg0 : i32, i32, i32
  }
}

</mosaic_0001>

<bundles_post_ra>
// kernel: tpu_custom_call.1
= control target key start
LH: loop header
LB: loop body
LE: loop exit
PB: predicated region body
PF: predicated region fallthrough
CT: control target
= control target key end

     0   :  { %8 = vsyncpa [#allocation3], 0  ;;  %s1003_s0 = inlined_call_operand.vmem [shape: bf16[2,1,34,64], index: 0, kind: input, shape index: {}]   ;;  %s1004_s1 = inlined_call_operand.hbm [shape: bf16[3,64,64], index: 1, kind: input, shape index: {}]   ;;  %s1005_s2 = inlined_call_operand.vmem [shape: f32[1,64], index: 2, kind: input, shape index: {}]   ;;  %s1006_s3 = inlined_call_operand.hbm [shape: bf16[2,32,64], index: 3, kind: output, shape index: {}]  }
   0x1   :  { %9 = vsyncpa [#allocation4], 0 }
   0x2   :  { %11 = vsyncpa [#allocation4 + $0x1], 0  ;;  %s892_s12 = smov 0   ;;  %s894_s13 = smov 0  }
   0x3   :  { %s896_s14 = smov 0   ;;  %s898_s15 = smov 0  }
   0x4   :  { %s900_s16 = smov 0   ;;  %s902_s17 = smov 0  }
   0x5 LB: > { %s583_s18 = sadd.s32 4294967295, %s865_s17   ;;  %s584_s19 = sadd.s32 4294967294, %s865_s17   ;;  %s865_s17 = sphi %s902_s17, %s17_s17   ;;  %s861_s16 = sphi %s900_s16, %s1013_s16   ;;  %s857_s15 = sphi %s898_s15, %s1012_s15   ;;  %s853_s14 = sphi %s896_s14, %s1011_s14   ;;  %s849_s13 = sphi %s894_s13, %s1010_s13   ;;  %s845_s12 = sphi %s892_s12, %s1009_s12  }
   0x6   : > { %s26_s20 = sadd.s32 1, %s861_s16  ;;  %s116_s21 = sadd.s32 1, %s853_s14 }
   0x7   : > { %p27_p0 = scmp.ge.s32.totalorder %s26_s20, 2  ;;  %p126_p1 = scmp.ne.s32.totalorder %s853_s14, %s849_s13 }
   0x8   : > { %p127_p2 = scmp.eq.s32.totalorder %s583_s18, 1  ;;  %p132_p3 = scmp.ne.s32.totalorder %s849_s13, %s845_s12 }
   0x9   : > { %s1015_s20 = smov (%p27_p0, %s26_s20), 0  ;;  %p133_p5 = scmp.eq.s32.totalorder %s584_s19, 1 }
   0xa   : > { %p932_p4 = por %p127_p2, %p126_p1  ;;  %s111_s23 = ssub.s32 %s861_s16, %s1015_s20 }
   0xb   : > { %p585_p6 = scmp.ge.s32.totalorder %s865_s17, 1  ;;  %p114_p7 = scmp.eq.s32.totalorder %s111_s23, 0 }
   0xc   : > { %p939_p8 = por %p133_p5, %p132_p3  ;;  %p140_p9 = scmp.lt.s32.totalorder %s865_s17, 3 }
   0xd   : > { %s945_s25 = scalar_select %p114_p7, %s853_s14, %s116_s21  }
   0xe   : > { %p141_p10 = pnand %p585_p6, %p140_p9  ;;  %p696_p11 = scmp.eq.s32.totalorder %s583_s18, 0 }
   0xf   : > { %s153_s28 = sshll.u32 %s1004_s1, 4  ;;  %s867_s29 = smov [#allocation2]   ;;  %s154_s28 = int_to_ptr.hbm [resolvable:$true] %s153_s28 }
  0x10   : > { %p688_p12 = pneg %p141_p10  ;;  %s155_s30 = sshll.u32 %s867_s29, 4  ;;  %s156_s30 = int_to_ptr.vmem [resolvable:$true] %s155_s30 }
  0x11   : > { %s868_s4 = smov 64   ;;  %s869_s5 = smov 4  }
  0x12   : > { %p689_p13 = pnand %p696_p11, %p688_p12  ;;  %185 = sbr.rel (%p141_p10) target bundleno = 210 (0xd2), region = 32 }
  0x14   : > { %691 = dma.hbm_to_vmem [thread:$0]  (!%p689_p13), %s154_s28, 1536, %s156_s30, [#allocation3], %s868_s4, %s868_s4, %s869_s5  }
  0x17   : > { %836 = dma.done.wait (%p696_p11), [#allocation3], 1536  }
  0x18   : > { %838 = vsyncadd (%p696_p11), [#allocation3], 4294965760  ;;  %p213_p0 = scmp.lt.s32.totalorder %s857_s15, 1  ;;  %v664_v0 = vld [vmem:[#allocation2 + $0x38] sm:$0xff]  ;;  %v663_v3 = vld [vmem:[#allocation2 + $0x30] sm:$0xff]  ;;  %vm388_vm1 = vcmask 1046528  }
  0x19   : > { %v660_v1 = vld [vmem:[#allocation2 + $0x18] sm:$0xff]  ;;  %313 = vmatpush.bf16.msra.mxu0 %v664_v0  ;;  %v659_v4 = vld [vmem:[#allocation2 + $0x10] sm:$0xff]  ;;  %677 = vmatpush.bf16.msra.mxu3 %v664_v0  ;;  %v662_v12 = vld [vmem:[#allocation2 + $0x28] sm:$0xff]  ;;  %vm257_vm0 = vsmask.f32 7424  ;;  %vm302_vm2 = vcmask 523264  }
  0x1a   : > { %s214_s6 = scalar_select %p213_p0, %s857_s15, 1  ;;  %v668_v2 = vld [vmem:[#allocation2 + $0x58] sm:$0xff]  ;;  %360 = vmatpush.bf16.msra.mxu1 %v660_v1  ;;  %v667_v5 = vld [vmem:[#allocation2 + $0x50] sm:$0xff]  ;;  %v658_v13 = vld [vmem:[#allocation2 + $0x8] sm:$0xff]  ;;  %vm463_vm3 = vcmask 519168  }
  0x1b   : > { %428 = vmatpush.bf16.msra.mxu2 %v668_v2  ;;  %v666_v17 = vld [vmem:[#allocation2 + $0x48] sm:$0xff]  ;;  %v661_v23 = vld [vmem:[#allocation2 + $0x20] sm:$0xff]  ;;  %s210_s19 = sand.u32 1, %s849_s13   ;;  %s669_s26 = sshll.u32 %s857_s15, 4 }
  0x1c   : > { %s681_s7 = smul.u32 20, %s214_s6  ;;  %v657_v24 = vld [vmem:[#allocation2] sm:$0xff]  ;;  %s591_s21 = sshll.u32 %s210_s19, 4 }
  0x1d   : > { %314 = vmatpush.bf16.msra.mxu0 %v663_v3  ;;  %678 = vmatpush.bf16.msra.mxu3 %v663_v3  ;;  %v665_v27 = vld [vmem:[#allocation2 + $0x40] sm:$0xff]  ;;  %s212_s23 = scalar_lea.vmem [#allocation5], %s591_s21  ;;  %s481_s29 = scalar_lea.hbm %s1006_s3, %s669_s26 }
  0x1e   : > { %s217_s10 = scalar_lea.vmem %s1003_s0, %s681_s7  ;;  %361 = vmatpush.bf16.msra.mxu1 %v659_v4  ;;  %v752_v40 = vld [vmem:[%s1005_s2] ss:$0 sm:$0xff]  ;;  %s482_s30 = sshll.u32 %s212_s23, 4  ;;  %s483_s30 = int_to_ptr.vmem [resolvable:$true] %s482_s30 }
  0x1f   : > { %v671_v6 = vld [vmem:[%s217_s10] sm:$0xff]   ;;  %v656_v7 = vld [vmem:[%s217_s10 + $0x8] sm:$0xff]  ;;  %v234_v11 = vld [vmem:[%s217_s10 + $0x10] sm:$0x1]  ;;  %429 = vmatpush.bf16.msra.mxu2 %v667_v5  ;;  %s484_s4 = sshll.u32 %s481_s29, 4  ;;  %s469_s15 = scalar_lea.sflag [#allocation4], %s210_s19  ;;  %s485_s4 = int_to_ptr.hbm [resolvable:$true] %s484_s4 }
  0x20   : > { %v674_v8 = vld [vmem:[%s217_s10] sm:$0xf0]  ;;  %v261_v9 = vshll.u32 %v671_v6, 16  ;;  %v675_v10 = vld [vmem:[%s217_s10] sm:$0xe]  ;;  %v259_v14 = vshrl.u32 %v671_v6, 16  ;;  %v253_v16 = vunpack.c.l.b16 %v234_v11 }
  0x21   : > { %v266_v15 = vshll.u32 %v656_v7, 16  ;;  %v676_v19 = vor.u32 %v675_v10, %v674_v8  ;;  %v270_v20 = vshrl.u32 %v656_v7, 16  ;;  %315 = vmatpush.bf16.msra.mxu0 %v662_v12  ;;  %679 = vmatpush.bf16.msra.mxu3 %v662_v12  ;;  %v390_v29 = vrot.slane %v656_v7, 1  ;;  %s797_s5 = sshra.s32 %s485_s4, 4  ;;  %s803_s9 = scalar_lea.hbm %s1006_s3, 32  ;;  %s798_s5 = int_to_ptr.hbm [resolvable:$true] %s797_s5 }
  0x22   : > { %v263_v18 = vrot.slane %v261_v9, 1  ;;  %v256_v21 = vpack.c.b16 %v253_v16, %v253_v16  ;;  %362 = vmatpush.bf16.msra.mxu1 %v658_v13  ;;  %s799_s6 = scalar_lea.hbm %s798_s5, 16  ;;  %p804_p5 = scmp.lt.s32.totalorder %s798_s5, %s1006_s3 }
  0x23   : > { %v268_v22 = vrot.slane %v266_v15, 1  ;;  %430 = vmatpush.bf16.msra.mxu2 %v666_v17  ;;  %v389_v28 = vrot.slane %v676_v19, 1  ;;  %p800_p1 = scmp.ne.s32.totalorder %s798_s5, %s799_s6  ;;  %p805_p6 = scmp.lt.s32.totalorder %s803_s9, %s799_s6 }
  0x24   : > { %v264_v25 = vor.u32 %v263_v18, %v259_v14  ;;  %v274_v26 = vshll.u32 %v256_v21, 16  ;;  %v392_v35 = vrot.slane %v256_v21, 1 }
  0x25   : > { %v272_v30 = vor.u32 %v270_v20, %v268_v22  ;;  %316 = vmatpush.bf16.msra.mxu0 %v661_v23  ;;  %v391_v33 = vsel %vm388_vm1, %v389_v28, %v390_v29  ;;  %680 = vmatpush.bf16.msra.mxu3 %v661_v23  ;;  %p801_p2 = pnand %p800_p1, %p932_p4  ;;  %p806_p7 = por %p805_p6, %p804_p5 }
  0x26   : > { %v276_v31 = vrot.slane %v274_v26, 1  ;;  %363 = vmatpush.bf16.msra.mxu1 %v657_v24  ;;  %v269_v32 = vsel %vm257_vm0, %v264_v25, %v268_v22  ;;  %v393_v36 = vsel %vm388_vm1, %v390_v29, %v392_v35 }
  0x27   : > { %431 = vmatpush.bf16.msra.mxu2 %v665_v27  ;;  %p802_p3 = pneg %p801_p2 }
  0x28   : > { %v277_v34 = vsel %vm257_vm0, %v272_v30, %v276_v31  ;;  %613 = vmatmul.msk.bf16.vlgmr.msra.gmra.mxu0 %vm302_vm2, %v269_v32 }
  0x29   : > { %631 = vmatmul.msk.bf16.vlgmr.msra.gmra.mxu1 %vm302_vm2, %v671_v6  ;;  %614 = vmatmul.msk.bf16.vlgmr.msra.gmra.mxu3 %vm302_vm2, %v277_v34  ;;  %p807_p9 = pnand %p806_p7, %p802_p3 }
  0x2a   : > { %649 = vmatmul.msk.bf16.vlgmr.msra.gmra.mxu2 %vm302_vm2, %v391_v33 }
  0x39   : > { %632 = vmatmul.msk.bf16.gmra.mxu1 %vm302_vm2, %v656_v7 }
  0x3a   : > { %650 = vmatmul.msk.bf16.gmra.mxu2 %vm302_vm2, %v393_v36 }
  0xa5   : > { %v318_v38 = vpop.f32.mrf.mxu0 }
  0xa6   : > { %v365_v37 = vpop.f32.mrf.mxu1 }
  0xa7   : > { %v366_v39 = vadd.f32 %v365_v37, %v318_v38 }
  0xac   : > { %v323_v53 = vpop.f32.mrf.mxu3 }
  0xad   : > { %v433_v41 = vpop.f32.mrf.mxu2  ;;  %v320_v45 = vpop.f32.mrf.mxu0 }
  0xae   : > { %v443_v42 = vadd.f32 %v433_v41, %v366_v39  ;;  %v367_v43 = vpop.f32.mrf.mxu1 }
  0xaf   : > { %v368_v48 = vadd.f32 %v367_v43, %v320_v45 }
  0xb0   : > { %v451_v44 = vadd.f32 %v752_v40, %v443_v42 }
  0xb2   : > { %v455_v46 = vmax.f32 %v451_v44, 0.0 }
  0xb4   : > { %v459_v47 = vpack.c.bf16 %v455_v46, %v455_v46  ;;  %v325_v62 = vpop.f32.mrf.mxu3 }
  0xb5   : > { %v435_v49 = vpop.f32.mrf.mxu2 }
  0xb6   : > { %464 = vst.msk [vmem:[%s212_s23] sm:$0xf] %vm463_vm3, %v459_v47  ;;  %v444_v50 = vadd.f32 %v435_v49, %v368_v48  ;;  %v370_v51 = vpop.f32.mrf.mxu1 }
  0xb7   : > { %v371_v55 = vadd.f32 %v370_v51, %v323_v53 }
  0xb8   : > { %v452_v52 = vadd.f32 %v752_v40, %v444_v50 }
  0xba   : > { %v456_v54 = vmax.f32 %v452_v52, 0.0 }
  0xbc   : > { %v460_v56 = vpack.c.bf16 %v456_v54, %v456_v54 }
  0xbd   : > { %v438_v57 = vpop.f32.mrf.mxu2 }
  0xbe   : > { %465 = vst.msk [vmem:[%s212_s23 + $0x4] sm:$0xf] %vm463_vm3, %v460_v56  ;;  %v445_v58 = vadd.f32 %v438_v57, %v371_v55  ;;  %v372_v60 = vpop.f32.mrf.mxu1 }
  0xbf   : > { %v373_v0 = vadd.f32 %v372_v60, %v325_v62 }
  0xc0   : > { %v453_v59 = vadd.f32 %v752_v40, %v445_v58 }
  0xc2   : > { %v457_v61 = vmax.f32 %v453_v59, 0.0 }
  0xc4   : > { %v461_v63 = vpack.c.bf16 %v457_v61, %v457_v61 }
  0xc5   : > { %v440_v1 = vpop.f32.mrf.mxu2 }
  0xc6   : > { %466 = vst.msk [vmem:[%s212_s23 + $0x8] sm:$0xf] %vm463_vm3, %v461_v63  ;;  %v446_v2 = vadd.f32 %v440_v1, %v373_v0 }
  0xc8   : > { %v454_v3 = vadd.f32 %v752_v40, %v446_v2 }
  0xca   : > { %v458_v4 = vmax.f32 %v454_v3, 0.0 }
  0xcc   : > { %v462_v5 = vpack.c.bf16 %v458_v4, %v458_v4 }
  0xce   : > { %467 = vst.msk [vmem:[%s212_s23 + $0xc] sm:$0xf] %vm463_vm3, %v462_v5 }
  0xcf   : > { %810 = shalt.err (!%p807_p9)
}
  0xd0   : > { %s870_s18 = smov 64   ;;  %s871_s19 = smov 4  }
  0xd1   : > { %686 = dma.vmem_to_hbm [thread:$0]  (%p932_p4), %s483_s30, 256, %s485_s4, %s469_s15, %s870_s18, %s870_s18, %s871_s19  }
  0xd2 PF: > { %p698_p10 = scmp.ge.s32.totalorder %s865_s17, 2  ;;  %s499_s21 = sand.u32 1, %s845_s12  }
  0xd3   : > { %s500_s23 = scalar_lea.sflag [#allocation4], %s499_s21 }
  0xd4   : > { %p693_p11 = pnand %p698_p10, %p939_p8 }
  0xd6   : > { %p694_p12 = pneg %p693_p11 }
  0xd8   : > { %840 = dma.done.wait (%p694_p12), %s500_s23, 256  }
  0xd9   : > { %842 = vsyncadd (%p694_p12), %s500_s23, 4294967040  ;;  %s17_s17 = sadd.s32 1, %s865_s17   ;;  %s1009_s12 = smov %s849_s13 }
  0xda   : > { %p14_p13 = scmp.ge.s32.totalorder %s17_s17, 4   ;;  %s1010_s13 = smov %s853_s14 }
  0xdb   : > { %s1011_s14 = smov %s945_s25  ;;  %s1012_s15 = smov %s861_s16 }
  0xdc   : > { %s1013_s16 = smov %s1015_s20  ;;  %16 = sbr.rel (!%p14_p13) target bundleno = 5 (0x5), region = 78 }
  0xe1   :  { %506 = vsyncpa [#allocation3], 1 }
  0xe2   :  { %508 = vsyncpa [#allocation3 + $0x1], 1 }
  0xe3   :  { %509 = vsyncpa [#allocation4], 1 }
  0xe4   :  { %511 = vsyncpa [#allocation4 + $0x1], 1 }

</bundles_post_ra>
